<compile_context>
chip_gen: v7x
topology: tpu7x:2x2x1
jax: 0.10.0
libtpu: 0.0.40
codegen_flags: <defaults>
</compile_context>

<pallas_src>
import jax
import jax.numpy as jnp
from jax.experimental import pallas as pl
from jax.experimental.pallas import tpu as pltpu


def _gconv_kernel(a_ref, x_ref, w_ref, b_ref, o_ref):
    # a_ref: (Bt, N, N)   x_ref: (Bt, N, Fin)
    # w_ref: (Fin, 2*Fout) fused [Wa | Wu]   b_ref: (1, 2*Fout) fused [ba | bu] (f32)
    # o_ref: (Bt, N, Fout)
    bt, n, fin = x_ref.shape
    fout = w_ref.shape[1] // 2

    A = a_ref[...]
    x = x_ref[...]
    cdt = x.dtype                      # MXU operand dtype (f32 or bf16)

    # ---- fused linear: one MXU pass computes a_fc and u_fc for all Bt*N nodes.
    lin = jnp.dot(x.reshape(bt * n, fin), w_ref[...],
                  preferred_element_type=jnp.float32)        # (Bt*N, 2*Fout), f32 acc
    lin = jnp.maximum(lin + b_ref[...], 0.0)                 # relu(ax) | relu(ux)
    relu_ax = lin[:, :fout].reshape(bt, n, fout)
    relu_ux = lin[:, fout:].reshape(bt, n, fout)

    # ---- F.normalize(A, p=1, dim=-2): exact reciprocal of column L1 norms (f32),
    #      folded into A as a cheap broadcast multiply (no N*N divide).
    a_f32 = A.astype(jnp.float32)
    col_l1 = jnp.sum(jnp.abs(a_f32), axis=1, keepdims=True)  # (Bt, 1, N)
    inv = 1.0 / jnp.maximum(col_l1, 1e-12)                   # exact -> keeps 1e-5 tol
    a_n = (a_f32 * inv).astype(cdt)                          # broadcast over rows

    # ---- graph aggregation + skip term (f32 accumulation on the MXU).
    agg = jnp.einsum('bij,bjf->bif', a_n, relu_ax.astype(cdt),
                     preferred_element_type=jnp.float32)
    o_ref[...] = (agg + relu_ux).astype(o_ref.dtype)


def _pick_batch_tile(total_b, n, fin, fout, itemsize, vmem_budget=8 << 20):
    """Largest divisor of total_b whose double-buffered blocks fit the budget,
    preferring to keep >= 2 grid steps so the parallel axis can split across
    TensorCores (v7x megacore)."""
    per_batch = (n * n + n * fin + 2 * n * fout) * itemsize
    divs = [d for d in range(1, total_b + 1) if total_b % d == 0]
    fits = [d for d in divs if 2 * d * per_batch <= vmem_budget] or [1]
    multi = [d for d in fits if total_b // d >= 2]
    return max(multi) if multi else max(fits)


def gconv_pallas(A, x, Wa, ba, Wu, bu, *, compute_dtype=jnp.float32, batch_tile=None):
    """Single Gconv forward. A: [B,N,N], x: [B,N,Fin] -> [B,N,Fout]."""
    B, N, Fin = x.shape
    Fout = Wa.shape[1]
    out_dtype = x.dtype

    # Fuse the two linear layers into one weight/bias; cast MXU operands.
    W2 = jnp.concatenate([Wa, Wu], axis=1).astype(compute_dtype)   # (Fin, 2*Fout)
    b2 = jnp.concatenate([ba, bu]).reshape(1, 2 * Fout).astype(jnp.float32)
    A_c = A.astype(compute_dtype)
    x_c = x.astype(compute_dtype)

    bt = batch_tile or _pick_batch_tile(
        B, N, Fin, Fout, jnp.dtype(compute_dtype).itemsize)
    grid = (B // bt,)

    return pl.pallas_call(
        _gconv_kernel,
        out_shape=jax.ShapeDtypeStruct((B, N, Fout), out_dtype),
        grid_spec=pltpu.PrefetchScalarGridSpec(
            num_scalar_prefetch=0,
            grid=grid,
            in_specs=[
                pl.BlockSpec((bt, N, N), lambda i: (i, 0, 0)),        # A
                pl.BlockSpec((bt, N, Fin), lambda i: (i, 0, 0)),      # x
                pl.BlockSpec((Fin, 2 * Fout), lambda i: (0, 0)),      # fused W
                pl.BlockSpec((1, 2 * Fout), lambda i: (0, 0)),        # fused bias
            ],
            out_specs=pl.BlockSpec((bt, N, Fout), lambda i: (i, 0, 0)),
        ),
        compiler_params=pltpu.CompilerParams(
            dimension_semantics=("parallel",)),
    )(A_c, x_c, W2, b2)


def gconv_layer_forward(g1, g2, params, compute_dtype=jnp.float32):
    """Gconv_layer.forward: apply the shared Gconv to both graphs.

    When the two graphs have matching shapes they are fused into a single
    pallas_call (one launch, one weight DMA)."""
    Wa, ba, Wu, bu = params
    A1, x1 = g1
    A2, x2 = g2
    if A1.shape == A2.shape and x1.shape == x2.shape:
        A = jnp.concatenate([A1, A2], axis=0)
        x = jnp.concatenate([x1, x2], axis=0)
        emb = gconv_pallas(A, x, Wa, ba, Wu, bu, compute_dtype=compute_dtype)
        B = A1.shape[0]
        return emb[:B], emb[B:]
    emb1 = gconv_pallas(A1, x1, Wa, ba, Wu, bu, compute_dtype=compute_dtype)
    emb2 = gconv_pallas(A2, x2, Wa, ba, Wu, bu, compute_dtype=compute_dtype)
    return emb1, emb2


def _reference(g, Wa, ba, Wu, bu):
    """Pure-JAX reference matching the PyTorch forward."""
    A, x = g
    col = jnp.sum(jnp.abs(A), axis=-2, keepdims=True)
    A_n = A / jnp.maximum(col, 1e-12)
    ax = jnp.maximum(x @ Wa + ba, 0.0)
    ux = jnp.maximum(x @ Wu + bu, 0.0)
    return jnp.einsum("bij,bjf->bif", A_n, ax) + ux


if __name__ == "__main__":
    key = jax.random.PRNGKey(0)
    B, N, Fin, Fout = 2, 16, 32, 32

    k = jax.random.split(key, 8)
    # Deterministic parameter init (synthetic; mimics nn.Linear uniform scale).
    bound = 1.0 / (Fin ** 0.5)
    Wa = jax.random.uniform(k[0], (Fin, Fout), jnp.float32, -bound, bound)
    ba = jax.random.uniform(k[1], (Fout,), jnp.float32, -bound, bound)
    Wu = jax.random.uniform(k[2], (Fin, Fout), jnp.float32, -bound, bound)
    bu = jax.random.uniform(k[3], (Fout,), jnp.float32, -bound, bound)

    # Inputs: adjacency-like (non-negative) matrices and node features.
    A1 = jax.random.uniform(k[4], (B, N, N), jnp.float32)
    x1 = jax.random.normal(k[5], (B, N, Fin), jnp.float32)
    A2 = jax.random.uniform(k[6], (B, N, N), jnp.float32)
    x2 = jax.random.normal(k[7], (B, N, Fin), jnp.float32)

    params = (Wa, ba, Wu, bu)

    # f32 path (numerically faithful to the PyTorch module).
    emb1, emb2 = gconv_layer_forward((A1, x1), (A2, x2), params)
    jax.block_until_ready((emb1, emb2))

    ref1 = _reference((A1, x1), Wa, ba, Wu, bu)
    ref2 = _reference((A2, x2), Wa, ba, Wu, bu)
    assert jnp.allclose(emb1, ref1, atol=1e-5, rtol=1e-5)
    assert jnp.allclose(emb2, ref2, atol=1e-5, rtol=1e-5)

    # bf16 MXU-operand path (v6e/v7x throughput option), f32 accumulation.
    b16_1, b16_2 = gconv_layer_forward((A1, x1), (A2, x2), params,
                                       compute_dtype=jnp.bfloat16)
    jax.block_until_ready((b16_1, b16_2))
    assert jnp.allclose(b16_1, ref1, atol=1e-1, rtol=1e-1)
    assert jnp.allclose(b16_2, ref2, atol=1e-1, rtol=1e-1)

    print("KERNEL_OK")
</pallas_src>

<mosaic_0001>
module attributes {stable_mosaic.version = 11 : i64} {
  func.func @_gconv_kernel(%arg0: i32, %arg1: memref<2x16x16xf32, #tpu.memory_space<vmem>>, %arg2: memref<2x16x32xf32, #tpu.memory_space<vmem>>, %arg3: memref<32x64xf32, #tpu.memory_space<vmem>>, %arg4: memref<1x64xf32, #tpu.memory_space<vmem>>, %arg5: memref<2x16x32xf32, #tpu.memory_space<vmem>>) attributes {dimension_semantics = [#tpu.dimension_semantics<parallel>], iteration_bounds = array<i64: 2>, scalar_prefetch = 0 : i64, scratch_operands = 0 : i64, tpu.core_type = #tpu.core_type<tc>, window_params = [{transform_indices = @transform_0, window_bounds = array<i64: 2, 16, 16>}, {transform_indices = @transform_1, window_bounds = array<i64: 2, 16, 32>}, {pipeline_mode = #tpu.pipeline_mode<synchronous>, transform_indices = @transform_2, window_bounds = array<i64: 32, 64>}, {pipeline_mode = #tpu.pipeline_mode<synchronous>, transform_indices = @transform_3, window_bounds = array<i64: 1, 64>}, {transform_indices = @transform_4, window_bounds = array<i64: 2, 16, 32>}]} {
    %c0 = arith.constant 0 : index
    %c0_0 = arith.constant 0 : index
    %c0_1 = arith.constant 0 : index
    %0 = vector.load %arg1[%c0, %c0_0, %c0_1] : memref<2x16x16xf32, #tpu.memory_space<vmem>>, vector<2x16x16xf32>
    %c0_2 = arith.constant 0 : index
    %c0_3 = arith.constant 0 : index
    %c0_4 = arith.constant 0 : index
    %1 = vector.load %arg2[%c0_2, %c0_3, %c0_4] : memref<2x16x32xf32, #tpu.memory_space<vmem>>, vector<2x16x32xf32>
    %2 = vector.shape_cast %1 : vector<2x16x32xf32> to vector<32x32xf32>
    %c0_5 = arith.constant 0 : index
    %c0_6 = arith.constant 0 : index
    %3 = vector.load %arg3[%c0_5, %c0_6] : memref<32x64xf32, #tpu.memory_space<vmem>>, vector<32x64xf32>
    %cst = arith.constant dense<0.000000e+00> : vector<32x64xf32>
    %4 = tpu.matmul %2, %3, %cst {dimension_numbers = #tpu.dot_dimension_numbers<[1], [0], [0], [1], [0, 0, 1, 1], [], []>} : vector<32x32xf32>, vector<32x64xf32>, vector<32x64xf32> -> vector<32x64xf32>
    %c0_7 = arith.constant 0 : index
    %c0_8 = arith.constant 0 : index
    %5 = vector.load %arg4[%c0_7, %c0_8] : memref<1x64xf32, #tpu.memory_space<vmem>>, vector<1x64xf32>
    %6 = vector.broadcast %5 : vector<1x64xf32> to vector<32x64xf32>
    %7 = arith.addf %4, %6 : vector<32x64xf32>
    %cst_9 = arith.constant 0.000000e+00 : f32
    %8 = vector.broadcast %cst_9 : f32 to vector<32x64xf32>
    %9 = arith.maximumf %7, %8 : vector<32x64xf32>
    %10 = vector.extract_strided_slice %9 {offsets = [0, 0], sizes = [32, 32], strides = [1, 1]} : vector<32x64xf32> to vector<32x32xf32>
    %11 = vector.shape_cast %10 : vector<32x32xf32> to vector<2x16x32xf32>
    %12 = vector.extract_strided_slice %9 {offsets = [0, 32], sizes = [32, 32], strides = [1, 1]} : vector<32x64xf32> to vector<32x32xf32>
    %13 = vector.shape_cast %12 : vector<32x32xf32> to vector<2x16x32xf32>
    %14 = math.absf %0 : vector<2x16x16xf32>
    %cst_10 = arith.constant dense<0.000000e+00> : vector<2x16xf32>
    %15 = vector.multi_reduction <add>, %14, %cst_10 [1] : vector<2x16x16xf32> to vector<2x16xf32>
    %16 = vector.shape_cast %15 : vector<2x16xf32> to vector<2x1x16xf32>
    %cst_11 = arith.constant 9.99999996E-13 : f32
    %17 = vector.broadcast %cst_11 : f32 to vector<2x1x16xf32>
    %18 = arith.maximumf %16, %17 : vector<2x1x16xf32>
    %cst_12 = arith.constant 1.000000e+00 : f32
    %19 = vector.broadcast %cst_12 : f32 to vector<2x1x16xf32>
    %20 = arith.divf %19, %18 : vector<2x1x16xf32>
    %21 = vector.broadcast %20 : vector<2x1x16xf32> to vector<2x16x16xf32>
    %22 = arith.mulf %0, %21 : vector<2x16x16xf32>
    "tpu.trace_start"() <{level = 10 : i32, message = "bij,bjf->bif"}> : () -> ()
    %cst_13 = arith.constant dense<0.000000e+00> : vector<2x16x32xf32>
    %23 = tpu.matmul %22, %11, %cst_13 {dimension_numbers = #tpu.dot_dimension_numbers<[2], [1], [1], [2], [0, 0, 0, 1, 1, 2], [0], [0]>} : vector<2x16x16xf32>, vector<2x16x32xf32>, vector<2x16x32xf32> -> vector<2x16x32xf32>
    "tpu.trace_stop"() : () -> ()
    %24 = arith.addf %23, %13 : vector<2x16x32xf32>
    %c0_14 = arith.constant 0 : index
    %c0_15 = arith.constant 0 : index
    %c0_16 = arith.constant 0 : index
    %25 = vector.load %arg5[%c0_14, %c0_15, %c0_16] : memref<2x16x32xf32, #tpu.memory_space<vmem>>, vector<2x16x32xf32>
    tpu.vector_store %arg5[%c0_14, %c0_15, %c0_16], %24 {strides = array<i32>} : memref<2x16x32xf32, #tpu.memory_space<vmem>>, vector<2x16x32xf32>,
    return
  }
  func.func @transform_0(%arg0: i32) -> (i32, i32, i32) {
    %c0_i32 = arith.constant 0 : i32
    %c0_i32_0 = arith.constant 0 : i32
    %c0_i32_1 = arith.constant 0 : i32
    return %arg0, %c0_i32, %c0_i32_0 : i32, i32, i32
  }
  func.func @transform_1(%arg0: i32) -> (i32, i32, i32) {
    %c0_i32 = arith.constant 0 : i32
    %c0_i32_0 = arith.constant 0 : i32
    %c0_i32_1 = arith.constant 0 : i32
    return %arg0, %c0_i32, %c0_i32_0 : i32, i32, i32
  }
  func.func @transform_2(%arg0: i32) -> (i32, i32) {
    %c0_i32 = arith.constant 0 : i32
    %c0_i32_0 = arith.constant 0 : i32
    %c0_i32_1 = arith.constant 0 : i32
    return %c0_i32, %c0_i32_0 : i32, i32
  }
  func.func @transform_3(%arg0: i32) -> (i32, i32) {
    %c0_i32 = arith.constant 0 : i32
    %c0_i32_0 = arith.constant 0 : i32
    %c0_i32_1 = arith.constant 0 : i32
    return %c0_i32, %c0_i32_0 : i32, i32
  }
  func.func @transform_4(%arg0: i32) -> (i32, i32, i32) {
    %c0_i32 = arith.constant 0 : i32
    %c0_i32_0 = arith.constant 0 : i32
    %c0_i32_1 = arith.constant 0 : i32
    return %arg0, %c0_i32, %c0_i32_0 : i32, i32, i32
  }
}

</mosaic_0001>

<bundles_post_ra>
// kernel: tpu_custom_call.1
= control target key start
LH: loop header
LB: loop body
LE: loop exit
PB: predicated region body
PF: predicated region fallthrough
CT: control target
= control target key end

     0   :  { %s1381_s0 = inlined_call_operand.hbm [shape: f32[4,16,16], index: 0, kind: input, shape index: {}]   ;;  %s1382_s1 = inlined_call_operand.hbm [shape: f32[4,16,32], index: 1, kind: input, shape index: {}]   ;;  %s1383_s2 = inlined_call_operand.hbm [shape: f32[32,64], index: 2, kind: input, shape index: {}]   ;;  %s1384_s3 = inlined_call_operand.vmem [shape: f32[1,64], index: 3, kind: input, shape index: {}]   ;;  %s1385_s4 = inlined_call_operand.hbm [shape: f32[4,16,32], index: 4, kind: output, shape index: {}]  }
   0x1   :  { %1393 = sst [smem:[#allocation14_spill]] %s1381_s0 }
   0x2   :  { %1394 = sst [smem:[#allocation15_spill]] %s1383_s2 }
   0x3   :  { %9 = vsyncpa [#allocation3], 0 }
   0x4   :  { %11 = vsyncpa [#allocation3 + $0x1], 0 }
   0x5   :  { %12 = vsyncpa [#allocation6], 0 }
   0x6   :  { %14 = vsyncpa [#allocation6 + $0x1], 0 }
   0x7   :  { %15 = vsyncpa [#allocation4], 0 }
   0x8   :  { %17 = vsyncpa [#allocation4 + $0x1], 0  ;;  %s1098_s15 = smov 0   ;;  %s1100_s16 = smov 0  }
   0x9   :  { %s1102_s17 = smov 0   ;;  %s1104_s18 = smov 0  }
   0xa LB: > { %s1119_s19 = sadd.s32 4294967295, %s1062_s18   ;;  %s731_s20 = sadd.s32 4294967294, %s1062_s18   ;;  %s1062_s18 = sphi %s1104_s18, %s1417_s18   ;;  %s1058_s17 = sphi %s1102_s17, %s1416_s17   ;;  %s1054_s16 = sphi %s1100_s16, %s1415_s16   ;;  %s1050_s15 = sphi %s1098_s15, %s1414_s15  }
   0xb   : > { %p43_p0 = scmp.ne.s32.totalorder %s1054_s16, %s1050_s15  ;;  %p1386_p1 = scmp.eq.s32.totalorder %s1119_s19, 0 }
   0xc   : > { %p141_p3 = scmp.eq.s32.totalorder %s731_s20, 1  ;;  %p732_p5 = scmp.ge.s32.totalorder %s1062_s18, 1 }
   0xd   : > { %p1128_p4 = por %p1386_p1, %p43_p0  ;;  %p148_p7 = scmp.lt.s32.totalorder %s1062_s18, 3 }
   0xe   : > { %p1133_p6 = por %p141_p3, %p43_p0  ;;  %s1064_s24 = smov [#allocation7]  }
   0xf   : > { %s1395_s21 = scalar_select %p1128_p4, 1, 0 }
  0x10   : > { %s1396_s22 = scalar_select %p1133_p6, 1, 0 }
  0x11   : > { %p1138_p8 = pnand %p732_p5, %p148_p7  ;;  %s160_s25 = sshll.u32 %s1064_s24, 4  ;;  %s1142_s25 = int_to_ptr.vmem [resolvable:$true] %s160_s25 }
  0x12   : > { %s1154_s27 = sadd.s32 1, %s1062_s18   ;;  %s30_s28 = sadd.s32 1, %s1058_s17 }
  0x13   : > { %s1397_s23 = scalar_select %p1138_p8, 1, 0 }
  0x14   : > { %p839_p9 = pneg %p1138_p8  ;;  %s27_s29 = ssub.s32 %s1062_s18, %s1154_s27 }
  0x15   : > { %s1399_s2 = sld [smem:[#allocation15_spill]] }
  0x16   : > { %p1149_p11 = pnand %p839_p9, %p1386_p1 }
  0x18   : > { %p902_p13 = pneg %p1149_p11 }
  0x1b   : > { %s900_s6 = scalar_lea.hbm %s1399_s2, 512 }
  0x1c   : > { %p901_p12 = scmp.ne.s32.totalorder %s1399_s2, %s900_s6  ;;  %p907_p5 = scmp.lt.u32.totalorder %s900_s6, %s1399_s2 }
  0x1e   : > { %p903_p0 = pnand %p902_p13, %p901_p12 }
  0x20   : > { %p904_p3 = pneg %p903_p0 }
  0x22   : > { %p909_p7 = pnand %p907_p5, %p904_p3 }
  0x24   : > { %912 = shalt.err (!%p909_p7)
}
  0x25   : > { %s913_s11 = scalar_lea.vmem %s1142_s25, 512  ;;  %p921_p2 = scmp.lt.s32.totalorder %s1142_s25, %s1142_s25 }
  0x26   : > { %p914_p9 = scmp.ne.s32.totalorder %s1142_s25, %s913_s11  ;;  %p922_p6 = scmp.lt.s32.totalorder %s913_s11, %s913_s11 }
  0x28   : > { %p916_p10 = pnand %p914_p9, %p902_p13  ;;  %p923_p4 = por %p922_p6, %p921_p2 }
  0x2a   : > { %p917_p1 = pneg %p916_p10 }
  0x2c   : > { %p924_p8 = pnand %p923_p4, %p917_p1 }
  0x2e   : > { %927 = shalt.err (!%p924_p8)
}
  0x2f   : > { %s1389_s12 = smov 128   ;;  %s1391_s13 = smov 8  }
  0x30   : > { %842 = dma.hbm_to_vmem [thread:$0]  (!%p1149_p11), %s1399_s2, 512, %s1142_s25, [#allocation6], %s1389_s12, %s1389_s12, %s1391_s13  }
  0x31   : > { %p28_p1 = scmp.eq.s32.totalorder %s27_s29, 0  ;;  %p37_p2 = scmp.ne.s32.totalorder %s1058_s17, %s1054_s16 }
  0x32   : > { %p38_p4 = scmp.eq.s32.totalorder %s1062_s18, 0  ;;  %p855_p6 = scmp.lt.s32.totalorder %s1062_s18, 2 }
  0x33   : > { %s1188_s24 = scalar_select %p28_p1, %s1058_s17, %s30_s28  }
  0x34   : > { %p39_p8 = por %p38_p4, %p37_p2  ;;  %p1401_p10 = scmp.eq.s32.totalorder %s1119_s19, 1 }
  0x35   : > { %1400 = sst [smem:[#allocation13_spill]] %s1188_s24  ;;  %s177_s26 = sand.u32 1, %s1058_s17  }
  0x36   : > { %p1192_p12 = por %p1401_p10, %p37_p2  ;;  %s764_s5 = sshll.u32 %s1062_s18, 9 }
  0x37   : > { %s1198_s6 = sshll.u32 %s177_s26, 5  ;;  %s1403_s0 = sld [smem:[#allocation14_spill]] }
  0x38   : > { %s181_s28 = scalar_lea.vmem [#allocation2], %s1198_s6  ;;  %p1206_p11 = pnand %p855_p6, %p39_p8 }
  0x39   : > { %s189_s29 = sshll.u32 %s181_s28, 4  ;;  %s1215_s14 = scalar_lea.hbm %s1382_s1, %s764_s5  ;;  %s1210_s29 = int_to_ptr.vmem [resolvable:$true] %s189_s29 }
  0x3a   : > { %s1217_s20 = scalar_lea.sflag [#allocation3], %s177_s26  ;;  %p930_p0 = pneg %p1206_p11 }
  0x3d   : > { %s1203_s25 = scalar_lea.hbm %s1403_s0, %s764_s5  ;;  %s933_s12 = scalar_lea.hbm %s1403_s0, 1024 }
  0x3e   : > { %s928_s7 = scalar_lea.hbm %s1203_s25, 512  ;;  %p934_p7 = scmp.lt.u32.totalorder %s1203_s25, %s1403_s0 }
  0x3f   : > { %p929_p13 = scmp.ne.s32.totalorder %s1203_s25, %s928_s7  ;;  %p935_p9 = scmp.lt.u32.totalorder %s933_s12, %s928_s7 }
  0x40   : > { %p937_p2 = scmp.lt.u32.totalorder %s928_s7, %s1203_s25 }
  0x41   : > { %p931_p3 = pnand %p930_p0, %p929_p13  ;;  %p936_p1 = por %p935_p9, %p934_p7 }
  0x43   : > { %p932_p5 = pneg %p931_p3  ;;  %p938_p4 = por %p937_p2, %p936_p1 }
  0x45   : > { %p939_p6 = pnand %p938_p4, %p932_p5 }
  0x47   : > { %942 = shalt.err (!%p939_p6)
}
  0x48   : > { %s943_s26 = scalar_lea.vmem %s1210_s29, 512  ;;  %s1067_s5 = smov [#allocation2]  }
  0x49   : > { %p944_p8 = scmp.ne.s32.totalorder %s1210_s29, %s943_s26  ;;  %s948_s10 = sshll.u32 %s1067_s5, 4  ;;  %s949_s10 = int_to_ptr.vmem [resolvable:$false] %s948_s10 }
  0x4a   : > { %s950_s2 = scalar_lea.vmem %s949_s10, 1024  ;;  %p951_p3 = scmp.lt.s32.totalorder %s1210_s29, %s949_s10 }
  0x4b   : > { %p946_p10 = pnand %p944_p8, %p930_p0  ;;  %p952_p7 = scmp.lt.s32.totalorder %s950_s2, %s943_s26 }
  0x4d   : > { %p947_p13 = pneg %p946_p10  ;;  %p953_p9 = por %p952_p7, %p951_p3 }
  0x4f   : > { %p954_p1 = pnand %p953_p9, %p947_p13 }
  0x51   : > { %957 = shalt.err (!%p954_p1)
}
  0x52   : > { %s1405_s12 = smov 8   ;;  %s1406_s13 = smov 128  }
  0x53   : > { %846 = dma.hbm_to_vmem [thread:$0]  (!%p1206_p11), %s1203_s25, 512, %s1210_s29, %s1217_s20, %s1406_s13, %s1406_s13, %s1405_s12  }
  0x54   : > { %s203_s11 = scalar_lea.vmem [#allocation5], %s1198_s6  ;;  %s199_s8 = sand.u32 1, %s1062_s18  }
  0x55   : > { %s211_s7 = sshll.u32 %s203_s11, 4  ;;  %s1252_s28 = scalar_lea.sflag [#allocation6], %s199_s8  ;;  %s1250_s7 = int_to_ptr.vmem [resolvable:$true] %s211_s7 }
  0x56   : > { %s958_s26 = scalar_lea.hbm %s1215_s14, 512  ;;  %s963_s2 = scalar_lea.hbm %s1382_s1, 1024 }
  0x57   : > { %p959_p5 = scmp.ne.s32.totalorder %s1215_s14, %s958_s26  ;;  %p964_p6 = scmp.lt.u32.totalorder %s1215_s14, %s1382_s1 }
  0x58   : > { %p965_p8 = scmp.lt.u32.totalorder %s963_s2, %s958_s26  ;;  %p967_p13 = scmp.lt.u32.totalorder %s958_s26, %s1215_s14 }
  0x59   : > { %p961_p2 = pnand %p959_p5, %p930_p0 }
  0x5a   : > { %p966_p10 = por %p965_p8, %p964_p6 }
  0x5b   : > { %p962_p4 = pneg %p961_p2 }
  0x5c   : > { %p968_p3 = por %p967_p13, %p966_p10 }
  0x5e   : > { %p969_p7 = pnand %p968_p3, %p962_p4 }
  0x60   : > { %972 = shalt.err (!%p969_p7)
}
  0x61   : > { %s973_s6 = scalar_lea.vmem %s1250_s7, 512  ;;  %s1068_s25 = smov [#allocation5]  }
  0x62   : > { %p974_p9 = scmp.ne.s32.totalorder %s1250_s7, %s973_s6  ;;  %s978_s29 = sshll.u32 %s1068_s25, 4  ;;  %s979_s29 = int_to_ptr.vmem [resolvable:$false] %s978_s29 }
  0x63   : > { %s980_s0 = scalar_lea.vmem %s979_s29, 1024  ;;  %p981_p2 = scmp.lt.s32.totalorder %s1250_s7, %s979_s29 }
  0x64   : > { %p976_p1 = pnand %p974_p9, %p930_p0  ;;  %p982_p6 = scmp.lt.s32.totalorder %s980_s0, %s973_s6 }
  0x66   : > { %p977_p5 = pneg %p976_p1  ;;  %p983_p8 = por %p982_p6, %p981_p2 }
  0x68   : > { %p984_p10 = pnand %p983_p8, %p977_p5 }
  0x6a   : > { %987 = shalt.err (!%p984_p10)
}
  0x6b   : > { %849 = dma.hbm_to_vmem [thread:$0]  (!%p1206_p11), %s1215_s14, 512, %s1250_s7, %s1252_s28, %s1406_s13, %s1406_s13, %s1405_s12  }
  0x6c   : > { %p1407_p0 = scmp.ne.s32.totalorder %s1397_s23, 0 }
  0x6d   : > { %s1284_s24 = sand.u32 (!%p1407_p0), 1, %s1054_s16   ;;  %p1408_p4 = scmp.ne.s32.totalorder (!%p1407_p0), %s1395_s21, 0 }
  0x6e   : > { %223 = sbr.rel (%p1407_p0) target bundleno = 592 (0x250), region = 36  ;;  %s1287_s20 = sshll.u32 (!%p1407_p0), %s1284_s24, 5 }
  0x6f   : > { %s226_s9 = scalar_lea.sflag (!%p1407_p0), [#allocation3], %s1284_s24  ;;  %s1291_s11 = scalar_lea.vmem (!%p1407_p0), [#allocation2], %s1287_s20 }
  0x75   : > { %1033 = dma.done.wait (%p1408_p4), %s226_s9, 512  }
  0x76   : > { %1035 = vsyncadd (%p1408_p4), %s226_s9, 4294966784  ;;  %s234_s23 = sand.u32 1, %s1119_s19   ;;  %s238_s12 = scalar_lea.vmem [#allocation5], %s1287_s20 }
  0x77   : > { %s235_s14 = scalar_lea.sflag [#allocation6], %s234_s23 }
  0x78   : > { %1037 = dma.done.wait (%p1408_p4), %s235_s14, 512  }
  0x79   : > { %1039 = vsyncadd (%p1408_p4), %s235_s14, 4294966784  ;;  %p1409_p11 = scmp.eq.s32.totalorder %s1119_s19, 0 }
  0x7b   : > { %1041 = dma.done.wait (%p1409_p11), [#allocation6], 512   ;;  %p1410_p13 = pmov %p1409_p11 }
  0x7c   : > { %vm294_vm0 = vcmask 261120   ;;  %v283_v0 = vld [vmem:[#allocation7] sm:$0xff]  ;;  %v284_v1 = vld [vmem:[#allocation7 + $0x8] sm:$0xff]  ;;  %v285_v2 = vld [vmem:[#allocation7 + $0x10] sm:$0xff]  ;;  %vm400_vm1 = vcmask 130048   ;;  %s1069_s7 = smov 96  }
  0x7d   : > { %1043 = vsyncadd (%p1410_p13), [#allocation6], 4294966784  ;;  %v813_v3 = vpack.c.bf16 %v284_v1, %v283_v0  ;;  %v286_v4 = vld [vmem:[#allocation7 + $0x18] sm:$0xff]  ;;  %v279_v5 = vld [vmem:[%s238_s12] sm:$0xff]  ;;  %s271_s8 = scalar_lea.vmem [#allocation8], %s1287_s20  ;;  %s768_s26 = sshll.u32 %s1119_s19, 9 }
  0x7e   : > { %v817_v6 = vpack.c.bf16 %v286_v4, %v285_v2  ;;  %793 = vmatprep.mubr.msk.f32.mxu0 %vm294_vm0, %v279_v5  ;;  %v280_v7 = vld [vmem:[%s238_s12 + $0x8] sm:$0xff]  ;;  %v281_v8 = vld [vmem:[%s238_s12 + $0x10] sm:$0xff]  ;;  %v282_v9 = vld [vmem:[%s238_s12 + $0x18] sm:$0xff]  ;;  %s626_s28 = sshll.u32 %s271_s8, 4  ;;  %s1335_s2 = scalar_lea.hbm %s1385_s4, %s768_s26  ;;  %s1329_s28 = int_to_ptr.vmem [resolvable:$true] %s626_s28 }
  0x7f   : > { %814 = vmatprep.subr.bf16.mxu0 %v813_v3  ;;  %v275_v10 = vld [vmem:[%s1291_s11] sm:$0xff]  ;;  %v276_v11 = vld [vmem:[%s1291_s11 + $0x8] sm:$0xff]  ;;  %v277_v27 = vld [vmem:[%s1291_s11 + $0x10] sm:$0xff]  ;;  %s612_s19 = scalar_lea.sflag [#allocation4], %s1284_s24  ;;  %s988_s6 = scalar_lea.vmem %s1329_s28, 512 }
  0x80   : > { %816 = vmatpush3.bf16.msra.mxu0 %v813_v3  ;;  %v396_v12 = vand.u32 2147483647, %v275_v10  ;;  %v397_v13 = vand.u32 2147483647, %v276_v11  ;;  %v278_v28 = vld [vmem:[%s1291_s11 + $0x18] sm:$0xff]  ;;  %p989_p3 = scmp.ne.s32.totalorder %s1329_s28, %s988_s6  ;;  %s1070_s25 = smov [#allocation8]  }
  0x81   : > { %818 = vmatprep.subr.bf16.mxu0 %v817_v6  ;;  %v398_v29 = vand.u32 2147483647, %v277_v27  ;;  %v399_v30 = vand.u32 2147483647, %v278_v28  ;;  %v748_v41 = vld [vmem:[%s1384_s3] ss:$0 sm:$0xff] }
  0x82   : > { %v401_v14 = vsel %vm400_vm1, %v396_v12, 0.0  ;;  %v402_v15 = vsel %vm400_vm1, %v397_v13, 0.0  ;;  %p990_p7 = pnand %p989_p3, %p1192_p12  ;;  %s992_s29 = sshll.u32 %s1070_s25, 4  ;;  %s993_s29 = int_to_ptr.vmem [resolvable:$false] %s992_s29 }
  0x83   : > { %v403_v16 = vadd.f32 %v402_v15, %v401_v14  ;;  %v410_v31 = vsel %vm400_vm1, %v398_v29, 0.0  ;;  %v411_v32 = vsel %vm400_vm1, %v399_v30, 0.0  ;;  %s994_s0 = scalar_lea.vmem %s993_s29, 1024  ;;  %p995_p1 = scmp.lt.s32.totalorder %s1329_s28, %s993_s29 }
  0x84   : > { %820 = vmatpush3.bf16.msra.mxu0 %v817_v6  ;;  %v412_v33 = vadd.f32 %v411_v32, %v410_v31  ;;  %p991_p9 = pneg %p990_p7  ;;  %p996_p5 = scmp.lt.s32.totalorder %s994_s0, %s988_s6 }
  0x85   : > { %v404_v17 = vrot.slane %v403_v16, 4 }
  0x86   : > { %v413_v34 = vrot.slane %v412_v33, 4  ;;  %p997_p2 = por %p996_p5, %p995_p1 }
  0x87   : > { %794 = vmatmul.mubr.msk.f32.vlgmr.msra.gmra.mrb[0].mxu0 %vm294_vm0, %v280_v7  ;;  %v405_v18 = vadd.f32 %v404_v17, %v403_v16 }
  0x88   : > { %796 = vmatprep.mubr.msk.f32.mxu0 %vm294_vm0, %v281_v8  ;;  %v414_v35 = vadd.f32 %v413_v34, %v412_v33  ;;  %p998_p6 = pnand %p997_p2, %p991_p9 }
  0x89   : > { %v406_v19 = vrot.slane %v405_v18, 2 }
  0x8a   : > { %v415_v36 = vrot.slane %v414_v35, 2 }
  0x8b   : > { %797 = vmatmul.mubr.msk.f32.gmra.mrb[2].mxu0 %vm294_vm0, %v282_v9  ;;  %v407_v20 = vadd.f32 %v406_v19, %v405_v18 }
  0x8c   : > { %v416_v37 = vadd.f32 %v415_v36, %v414_v35 }
  0x8d   : > { %v408_v21 = vrot.slane %v407_v20, 1 }
  0x8e   : > { %v417_v38 = vrot.slane %v416_v37, 1 }
  0x8f   : > { %v409_v22 = vadd.f32 %v408_v21, %v407_v20 }
  0x90   : > { %v418_v39 = vadd.f32 %v417_v38, %v416_v37 }
  0x91   : > { %v419_v23 = vmax.f32 %v409_v22, 1e-12 }
  0x92   : > { %v420_v40 = vmax.f32 %v418_v39, 1e-12 }
  0x93   : > { %896 = vrcp.f32 %v419_v23 }
  0x94   : > { %898 = vrcp.f32 %v420_v40 }
  0x9d   : > { %v897_v24 = vpop.eup %896 }
  0x9e   : > { %v425_v25 = vmul.f32 %v897_v24, %v275_v10  ;;  %v426_v26 = vmul.f32 %v897_v24, %v276_v11  ;;  %v899_v51 = vpop.eup %898 }
  0x9f   : > { %v427_v56 = vmul.f32 %v899_v51, %v277_v27  ;;  %v428_v58 = vmul.f32 %v899_v51, %v278_v28 }
  0xa0   : > { %803 = vmatprep.mubr.msk.f32.mxu1 %vm400_vm1, %v425_v25 }
 0x15a   : > { %v795_v42 = vpop.f32.mrb[0].mxu0 }
 0x15b   : > { %v379_v43 = vadd.f32 %v795_v42, %v748_v41  ;;  %v373_v44 = vpop.f32.mrb[1].mxu0 }
 0x15c   : > { %v374_v45 = vadd.f32 %v748_v41, %v373_v44 }
 0x15d   : > { %v393_v46 = vmax.f32 %v379_v43, 0.0 }
 0x15e   : > { %v392_v47 = vmax.f32 %v374_v45, 0.0  ;;  %v798_v48 = vpop.f32.mrb[2].mxu0 }
 0x15f   : > { %v389_v49 = vadd.f32 %v798_v48, %v748_v41  ;;  %v383_v50 = vpop.f32.mrb[3].mxu0 }
 0x160   : > { %v384_v52 = vadd.f32 %v748_v41, %v383_v50  ;;  %431 = vrot.lane.b32.xlu0 %v392_v47, %s1069_s7  ;;  %v821_v53 = vpack.c.bf16 %v393_v46, %v392_v47 }
 0x161   : > { %v395_v54 = vmax.f32 %v389_v49, 0.0 }
 0x162   : > { %v394_v55 = vmax.f32 %v384_v52, 0.0  ;;  %822 = vmatprep.subr.bf16.mxu1 %v821_v53 }
 0x163   : > { %824 = vmatpush3.bf16.msra.mxu1 %v821_v53 }
 0x164   : > { %v825_v57 = vpack.c.bf16 %v395_v54, %v394_v55  ;;  %520 = vrot.lane.b32.xlu1 %v394_v55, %s1069_s7  ;;  %433 = vrot.lane.b32.xlu0 %v393_v46, %s1069_s7 }
 0x166   : > { %804 = vmatmul.mubr.msk.f32.vlgmr.msra.gmra.mrb[0].mxu1 %vm400_vm1, %v426_v26  ;;  %826 = vmatprep.subr.bf16.mxu1 %v825_v57 }
 0x167   : > { %828 = vmatpush3.bf16.msra.mxu1 %v825_v57  ;;  %810 = vmatprep.mubr.msk.f32.mxu1 %vm400_vm1, %v427_v56 }
 0x168   : > { %522 = vrot.lane.b32.xlu1 %v395_v54, %s1069_s7 }
 0x16a   : > { %811 = vmatmul.mubr.msk.f32.vlgmr.msra.gmra.mrb[2].mxu1 %vm400_vm1, %v428_v58 }
 0x1d2   : > { %v432_v59 = vpop.permute.xlu0 %431 }
 0x1d6   : > { %v521_v60 = vpop.permute.xlu1 %520  ;;  %v434_v61 = vpop.permute.xlu0 %433 }
 0x1da   : > { %v523_v2 = vpop.permute.xlu1 %522 }
 0x239   : > { %v805_v62 = vpop.f32.mrb[0].mxu1 }
 0x23a   : > { %v515_v63 = vadd.f32 %v805_v62, %v434_v61  ;;  %v509_v0 = vpop.f32.mrb[1].mxu1 }
 0x23b   : > { %v510_v1 = vadd.f32 %v509_v0, %v432_v59 }
 0x23c   : > { %608 = vst.msk [vmem:[%s271_s8 + $0x8] sm:$0xff] %vm294_vm0, %v515_v63 }
 0x23d   : > { %607 = vst.msk [vmem:[%s271_s8] sm:$0xff] %vm294_vm0, %v510_v1  ;;  %v812_v3 = vpop.f32.mrb[2].mxu1 }
 0x23e   : > { %v604_v4 = vadd.f32 %v812_v3, %v523_v2  ;;  %v598_v5 = vpop.f32.mrb[3].mxu1 }
 0x23f   : > { %v599_v6 = vadd.f32 %v598_v5, %v521_v60 }
 0x240   : > { %610 = vst.msk [vmem:[%s271_s8 + $0x18] sm:$0xff] %vm294_vm0, %v604_v4 }
 0x241   : > { %609 = vst.msk [vmem:[%s271_s8 + $0x10] sm:$0xff] %vm294_vm0, %v599_v6 }
 0x242   : > { %1001 = shalt.err (!%p998_p6)
}
 0x243   : > { %s1002_s20 = scalar_lea.hbm %s1335_s2, 512  ;;  %s1006_s23 = scalar_lea.hbm %s1385_s4, 1024 }
 0x244   : > { %p1003_p8 = scmp.ne.s32.totalorder %s1335_s2, %s1002_s20  ;;  %p1007_p4 = scmp.lt.u32.totalorder %s1335_s2, %s1385_s4 }
 0x245   : > { %p1008_p11 = scmp.lt.u32.totalorder %s1006_s23, %s1002_s20  ;;  %p1010_p3 = scmp.lt.u32.totalorder %s1002_s20, %s1335_s2 }
 0x246   : > { %p1004_p10 = pnand %p1003_p8, %p1192_p12 }
 0x247   : > { %p1009_p13 = por %p1008_p11, %p1007_p4 }
 0x248   : > { %p1005_p0 = pneg %p1004_p10 }
 0x249   : > { %p1011_p7 = por %p1010_p3, %p1009_p13 }
 0x24b   : > { %p1012_p9 = pnand %p1011_p7, %p1005_p0 }
 0x24d   : > { %1015 = shalt.err (!%p1012_p9)
}
 0x24e   : > { %s1071_s21 = smov 128   ;;  %s1072_s13 = smov 8  }
 0x24f   : > { %837 = dma.vmem_to_hbm [thread:$0]  (%p1192_p12), %s1329_s28, 512, %s1335_s2, %s612_s19, %s1071_s21, %s1071_s21, %s1072_s13  }
 0x250 PF: > { %s641_s7 = sand.u32 1, %s1050_s15   ;;  %p1411_p1 = scmp.ne.s32.totalorder %s1396_s22, 0 }
 0x251   : > { %p1412_p5 = scmp.ge.s32.totalorder %s1062_s18, 2  ;;  %s642_s8 = scalar_lea.sflag [#allocation4], %s641_s7 }
 0x253   : > { %p851_p2 = pnand %p1412_p5, %p1411_p1 }
 0x255   : > { %1045 = dma.done.wait (!%p851_p2), %s642_s8, 512  }
 0x256   : > { %1047 = vsyncadd (!%p851_p2), %s642_s8, 4294966784  ;;  %s1413_s26 = sld [smem:[#allocation13_spill]]  ;;  %p20_p6 = scmp.ge.s32.totalorder %s1154_s27, 4  }
 0x257   : > { %s1414_s15 = smov %s1054_s16  ;;  %s1415_s16 = smov %s1058_s17 }
 0x258   : > { %s1417_s18 = smov %s1154_s27  ;;  %22 = sbr.rel (!%p20_p6) target bundleno = 10 (0xa), region = 98 }
 0x25c   : > { %s1416_s17 = smov %s1413_s26 }
 0x25f   :  { %647 = vsyncpa [#allocation3], 1 }
 0x260   :  { %649 = vsyncpa [#allocation3 + $0x1], 1 }
 0x261   :  { %650 = vsyncpa [#allocation6], 1 }
 0x262   :  { %652 = vsyncpa [#allocation6 + $0x1], 1 }
 0x263   :  { %653 = vsyncpa [#allocation4], 1 }
 0x264   :  { %655 = vsyncpa [#allocation4 + $0x1], 1 }

</bundles_post_ra>
